<compile_context>
chip_gen: v7x
topology: tpu7x:2x2x1
jax: 0.10.0
libtpu: 0.0.40
codegen_flags: <defaults>
</compile_context>

<pallas_src>
import jax
import jax.numpy as jnp
import numpy as np
from jax.experimental import pallas as pl
from jax.experimental.pallas import tpu as pltpu


def _round_up(v, m):
    return -(-v // m) * m


def _bright_u_kernel(x_ref, w_ref, b_ref, ones_ref, o_ref):
    # x_ref: (TR, Kp), w_ref: (Kp, Dp), b_ref: (1, Dp), ones_ref: (Dp, Dp), o_ref: (TR, Dp)
    y = jnp.dot(x_ref[...], w_ref[...], preferred_element_type=jnp.float32)
    y = y + b_ref[...]                                   # broadcast bias over rows
    # Per-logical-row L1, broadcast back over each dim-wide lane segment via a
    # block-diagonal ones matrix (MXU; avoids sub-lane reshapes / reductions).
    l1 = jnp.dot(jnp.abs(y), ones_ref[...], preferred_element_type=jnp.float32)
    # Exact division (matches torch F.normalize; eps identical).
    o_ref[...] = (y / jnp.maximum(l1, 1e-12)).astype(o_ref.dtype)


def _plan_rows(n_rows, pack, kp, dp):
    """Choose (padded logical rows, packed-row tile, grid steps) for one input."""
    np_rows = -(-n_rows // pack)                     # packed rows needed
    if np_rows <= 8:
        return np_rows * pack, np_rows, 1            # single full-extent block
    try:
        vmem_cap = pltpu.get_tpu_info().vmem_capacity_bytes
    except Exception:
        vmem_cap = 64 << 20                          # v7x physical VMEM (worst case)
    budget = min(vmem_cap // 2, 24 << 20)            # x + out, double-buffered
    bytes_per_packed_row = 2 * 4 * (_round_up(kp, 128) + _round_up(dp, 128))
    tr_max = max(8, (budget // bytes_per_packed_row) // 8 * 8)
    steps = -(-np_rows // tr_max)
    if steps == 1 and np_rows >= 512:
        steps = 2                                    # give v7x's 2nd TensorCore work
    tr = _round_up(-(-np_rows // steps), 8)
    return steps * tr * pack, tr, steps


def _linear_l1_normalize(xp, w_blk, b_blk, ones_blk, *, tile_rows, steps):
    np_rows, kp = xp.shape
    dp = w_blk.shape[1]
    assert np_rows == steps * tile_rows
    f32 = 4

    # VMEM accounting with physical (8,128) tile padding.
    def buf_bytes(rows, cols):
        return _round_up(max(rows, 1), 8) * _round_up(max(cols, 1), 128) * f32

    vmem_bytes = (2 * buf_bytes(tile_rows, kp)       # x tile (double-buffered)
                  + 2 * buf_bytes(tile_rows, dp)     # out tile (double-buffered)
                  + 2 * buf_bytes(kp, dp)            # weight (grid-invariant)
                  + 2 * buf_bytes(dp, dp)            # ones   (grid-invariant)
                  + 2 * buf_bytes(1, dp)             # bias   (grid-invariant)
                  + (2 << 20))                       # headroom
    vmem_bytes = min(int(vmem_bytes), 60 << 20)      # stay under v7x physical VMEM

    cost = pl.CostEstimate(
        flops=2 * np_rows * kp * dp + 2 * np_rows * dp * dp,
        transcendentals=0,
        bytes_accessed=f32 * (np_rows * kp + kp * dp + dp + dp * dp + np_rows * dp),
    )

    # TODO(synk): weight/bias/ones have constant index_maps; pipeline_mode=pl.Buffered(1)
    # would save one VMEM buffer each (~192 KiB) - skipped for maximal portability.
    return pl.pallas_call(
        _bright_u_kernel,
        out_shape=jax.ShapeDtypeStruct((np_rows, dp), jnp.float32),
        grid_spec=pltpu.PrefetchScalarGridSpec(
            num_scalar_prefetch=0,
            grid=(steps,),
            in_specs=[
                pl.BlockSpec((tile_rows, kp), lambda i: (i, 0)),  # packed x tile
                pl.BlockSpec((kp, dp), lambda i: (0, 0)),         # block-diag W (resident)
                pl.BlockSpec((1, dp), lambda i: (0, 0)),          # packed bias (resident)
                pl.BlockSpec((dp, dp), lambda i: (0, 0)),         # block-diag ones (resident)
            ],
            out_specs=pl.BlockSpec((tile_rows, dp), lambda i: (i, 0)),
        ),
        compiler_params=pltpu.CompilerParams(
            dimension_semantics=("parallel",),
            vmem_limit_bytes=vmem_bytes,
        ),
        cost_estimate=cost,
    )(xp, w_blk, b_blk, ones_blk)


def _one_embedding(x, w_blk, b_blk, ones_blk, pack, dim):
    n, rwr_dim = x.shape
    kp = pack * rwr_dim
    dp = pack * dim
    n_pad, tile_rows, steps = _plan_rows(n, pack, kp, dp)
    if n_pad != n:
        # Only when shapes are ragged; padding is bounded (< 8*steps packed rows).
        x = jnp.pad(x, ((0, n_pad - n), (0, 0)))
    xp = x.reshape(n_pad // pack, kp)            # `pack` logical rows per 128-lane vreg
    out_p = _linear_l1_normalize(xp, w_blk, b_blk, ones_blk,
                                 tile_rows=tile_rows, steps=steps)
    return out_p.reshape(n_pad, dim)[:n]


def bright_u_forward(rwr1_emd, rwr2_emd, weight, bias):
    """weight: (dim, rwr_dim) as in torch.nn.Linear; bias: (dim,)."""
    dim, rwr_dim = weight.shape
    # Lane-dense packing factor: `pack` logical rows share one 128-lane vreg.
    pack = 128 // dim if (dim < 128 and 128 % dim == 0) else 1

    eye = jnp.eye(pack, dtype=jnp.float32)
    w_t = weight.T.astype(jnp.float32)                              # (rwr_dim, dim)
    w_blk = jnp.kron(eye, w_t)                                      # (pack*rwr_dim, pack*dim)
    b_blk = jnp.tile(bias.astype(jnp.float32), pack).reshape(1, pack * dim)
    ones_blk = jnp.kron(eye, jnp.ones((dim, dim), jnp.float32))     # (pack*dim, pack*dim)

    # Two independent calls: no concat/pad HBM pass over x; the extra ~192 KiB of
    # weight/bias/ones DMA and one launch are negligible vs. streaming x twice.
    out1 = _one_embedding(rwr1_emd, w_blk, b_blk, ones_blk, pack, dim)
    out2 = _one_embedding(rwr2_emd, w_blk, b_blk, ones_blk, pack, dim)
    return out1, out2


if __name__ == "__main__":
    # Small shapes consistent with the module: N nodes = 8, rwr_dim = 32, dim = 32.
    N, RWR_DIM, DIM = 8, 32, 32

    key = jax.random.PRNGKey(0)
    k1, k2, kw, kb = jax.random.split(key, 4)

    rwr1 = jax.random.normal(k1, (N, RWR_DIM), dtype=jnp.float32)
    rwr2 = jax.random.normal(k2, (N, RWR_DIM), dtype=jnp.float32)

    # Deterministic Linear params (torch-style shapes: weight (dim, rwr_dim), bias (dim,)).
    bound = 1.0 / (RWR_DIM ** 0.5)
    weight = jax.random.uniform(kw, (DIM, RWR_DIM), jnp.float32, -bound, bound)
    bias = jax.random.uniform(kb, (DIM,), jnp.float32, -bound, bound)

    out1, out2 = bright_u_forward(rwr1, rwr2, weight, bias)
    jax.block_until_ready((out1, out2))

    # Backend-independent float64 reference (avoids comparing against the TPU's
    # own default-precision matmul, which caused the previous failure).
    def ref(x):
        xq = np.asarray(x, np.float64)
        wq = np.asarray(weight, np.float64)
        bq = np.asarray(bias, np.float64)
        y = xq @ wq.T + bq
        return y / np.maximum(np.abs(y).sum(axis=1, keepdims=True), 1e-12)

    assert out1.shape == (N, DIM) and out2.shape == (N, DIM)
    # Tolerance covers the MXU's f32-via-bf16 matmul decomposition on real TPUs.
    assert np.allclose(np.asarray(out1), ref(rwr1), atol=1e-3, rtol=1e-3)
    assert np.allclose(np.asarray(out2), ref(rwr2), atol=1e-3, rtol=1e-3)
    print("KERNEL_OK")
</pallas_src>

<mosaic_0001>
module attributes {stable_mosaic.version = 11 : i64} {
  func.func @_bright_u_kernel(%arg0: i32, %arg1: memref<2x128xf32, #tpu.memory_space<vmem>>, %arg2: memref<128x128xf32, #tpu.memory_space<vmem>>, %arg3: memref<1x128xf32, #tpu.memory_space<vmem>>, %arg4: memref<128x128xf32, #tpu.memory_space<vmem>>, %arg5: memref<2x128xf32, #tpu.memory_space<vmem>>) attributes {dimension_semantics = [#tpu.dimension_semantics<parallel>], iteration_bounds = array<i64: 1>, scalar_prefetch = 0 : i64, scratch_operands = 0 : i64, tpu.core_type = #tpu.core_type<tc>, window_params = [{transform_indices = @transform_0, window_bounds = array<i64: 2, 128>}, {pipeline_mode = #tpu.pipeline_mode<synchronous>, transform_indices = @transform_1, window_bounds = array<i64: 128, 128>}, {pipeline_mode = #tpu.pipeline_mode<synchronous>, transform_indices = @transform_2, window_bounds = array<i64: 1, 128>}, {pipeline_mode = #tpu.pipeline_mode<synchronous>, transform_indices = @transform_3, window_bounds = array<i64: 128, 128>}, {transform_indices = @transform_4, window_bounds = array<i64: 2, 128>}]} {
    %c0 = arith.constant 0 : index
    %c0_0 = arith.constant 0 : index
    %0 = vector.load %arg1[%c0, %c0_0] : memref<2x128xf32, #tpu.memory_space<vmem>>, vector<2x128xf32>
    %c0_1 = arith.constant 0 : index
    %c0_2 = arith.constant 0 : index
    %1 = vector.load %arg2[%c0_1, %c0_2] : memref<128x128xf32, #tpu.memory_space<vmem>>, vector<128x128xf32>
    %cst = arith.constant dense<0.000000e+00> : vector<2x128xf32>
    %2 = tpu.matmul %0, %1, %cst {dimension_numbers = #tpu.dot_dimension_numbers<[1], [0], [0], [1], [0, 0, 1, 1], [], []>} : vector<2x128xf32>, vector<128x128xf32>, vector<2x128xf32> -> vector<2x128xf32>
    %c0_3 = arith.constant 0 : index
    %c0_4 = arith.constant 0 : index
    %3 = vector.load %arg3[%c0_3, %c0_4] : memref<1x128xf32, #tpu.memory_space<vmem>>, vector<1x128xf32>
    %4 = vector.broadcast %3 : vector<1x128xf32> to vector<2x128xf32>
    %5 = arith.addf %2, %4 : vector<2x128xf32>
    %6 = math.absf %5 : vector<2x128xf32>
    %c0_5 = arith.constant 0 : index
    %c0_6 = arith.constant 0 : index
    %7 = vector.load %arg4[%c0_5, %c0_6] : memref<128x128xf32, #tpu.memory_space<vmem>>, vector<128x128xf32>
    %cst_7 = arith.constant dense<0.000000e+00> : vector<2x128xf32>
    %8 = tpu.matmul %6, %7, %cst_7 {dimension_numbers = #tpu.dot_dimension_numbers<[1], [0], [0], [1], [0, 0, 1, 1], [], []>} : vector<2x128xf32>, vector<128x128xf32>, vector<2x128xf32> -> vector<2x128xf32>
    %cst_8 = arith.constant 9.99999996E-13 : f32
    %9 = vector.broadcast %cst_8 : f32 to vector<2x128xf32>
    %10 = arith.maximumf %8, %9 : vector<2x128xf32>
    %11 = arith.divf %5, %10 : vector<2x128xf32>
    %c0_9 = arith.constant 0 : index
    %c0_10 = arith.constant 0 : index
    %12 = vector.load %arg5[%c0_9, %c0_10] : memref<2x128xf32, #tpu.memory_space<vmem>>, vector<2x128xf32>
    tpu.vector_store %arg5[%c0_9, %c0_10], %11 {strides = array<i32>} : memref<2x128xf32, #tpu.memory_space<vmem>>, vector<2x128xf32>,
    return
  }
  func.func @transform_0(%arg0: i32) -> (i32, i32) {
    %c0_i32 = arith.constant 0 : i32
    %c0_i32_0 = arith.constant 0 : i32
    return %arg0, %c0_i32 : i32, i32
  }
  func.func @transform_1(%arg0: i32) -> (i32, i32) {
    %c0_i32 = arith.constant 0 : i32
    %c0_i32_0 = arith.constant 0 : i32
    %c0_i32_1 = arith.constant 0 : i32
    return %c0_i32, %c0_i32_0 : i32, i32
  }
  func.func @transform_2(%arg0: i32) -> (i32, i32) {
    %c0_i32 = arith.constant 0 : i32
    %c0_i32_0 = arith.constant 0 : i32
    %c0_i32_1 = arith.constant 0 : i32
    return %c0_i32, %c0_i32_0 : i32, i32
  }
  func.func @transform_3(%arg0: i32) -> (i32, i32) {
    %c0_i32 = arith.constant 0 : i32
    %c0_i32_0 = arith.constant 0 : i32
    %c0_i32_1 = arith.constant 0 : i32
    return %c0_i32, %c0_i32_0 : i32, i32
  }
  func.func @transform_4(%arg0: i32) -> (i32, i32) {
    %c0_i32 = arith.constant 0 : i32
    %c0_i32_0 = arith.constant 0 : i32
    return %arg0, %c0_i32 : i32, i32
  }
}

</mosaic_0001>

<bundles_post_ra>
// kernel: tpu_custom_call.1
= control target key start
LH: loop header
LB: loop body
LE: loop exit
PB: predicated region body
PF: predicated region fallthrough
CT: control target
= control target key end

     0   :  { %9 = vsyncpa [#allocation3], 0  ;;  %s623_s0 = inlined_call_operand.hbm [shape: f32[2,128], index: 0, kind: input, shape index: {}]   ;;  %s624_s1 = inlined_call_operand.hbm [shape: f32[128,128], index: 1, kind: input, shape index: {}]   ;;  %s625_s2 = inlined_call_operand.vmem [shape: f32[1,128], index: 2, kind: input, shape index: {}]   ;;  %s626_s3 = inlined_call_operand.hbm [shape: f32[128,128], index: 3, kind: input, shape index: {}]   ;;  %s627_s4 = inlined_call_operand.hbm [shape: f32[2,128], index: 4, kind: output, shape index: {}]  }
   0x1   :  { %10 = vsyncpa [#allocation6], 0 }
   0x2   :  { %11 = vsyncpa [#allocation4], 0  ;;  %s516_s15 = smov [#allocation5]   ;;  %s422_s19 = scalar_lea.hbm %s624_s1, 2048 }
   0x3   :  { %s27_s16 = sshll.u32 %s516_s15, 4  ;;  %p423_p0 = scmp.ne.s32.totalorder %s624_s1, %s422_s19  ;;  %s28_s16 = int_to_ptr.vmem [resolvable:$true] %s27_s16 }
   0x4   :  { %p426_p1 = scmp.lt.u32.totalorder %s422_s19, %s624_s1 }
   0x6   :  { %p428_p2 = pnand %p426_p1, %p423_p0 }
   0x8   :  { %431 = shalt.err (!%p428_p2)
}
   0x9   :  { %s432_s24 = scalar_lea.vmem %s28_s16, 2048  ;;  %p437_p4 = scmp.lt.s32.totalorder %s28_s16, %s28_s16 }
   0xa   :  { %p433_p3 = scmp.ne.s32.totalorder %s28_s16, %s432_s24  ;;  %p438_p5 = scmp.lt.s32.totalorder %s432_s24, %s432_s24 }
   0xc   :  { %p439_p6 = por %p438_p5, %p437_p4 }
   0xe   :  { %p440_p7 = pnand %p439_p6, %p433_p3 }
  0x10   :  { %443 = shalt.err (!%p440_p7)
}
  0x11   :  { %s517_s25 = smov 128   ;;  %s518_s26 = smov 8  }
  0x12   :  { %33 = dma.hbm_to_vmem [thread:$0]  %s624_s1, 2048, %s28_s16, [#allocation6], %s517_s25, %s517_s25, %s518_s26  }
  0x13   :  { %s519_s29 = smov [#allocation2]   ;;  %s520_s5 = smov [#allocation7]  }
  0x14   :  { %s18_s30 = sshll.u32 %s519_s29, 4  ;;  %s41_s6 = sshll.u32 %s520_s5, 4  ;;  %s19_s30 = int_to_ptr.vmem [resolvable:$true] %s18_s30  ;;  %s42_s6 = int_to_ptr.vmem [resolvable:$true] %s41_s6 }
  0x15   :  { %s444_s9 = scalar_lea.hbm %s623_s0, 32 }
  0x16   :  { %p445_p8 = scmp.ne.s32.totalorder %s623_s0, %s444_s9  ;;  %p448_p9 = scmp.lt.u32.totalorder %s444_s9, %s623_s0 }
  0x18   :  { %p450_p10 = pnand %p448_p9, %p445_p8 }
  0x1a   :  { %453 = shalt.err (!%p450_p10)
}
  0x1b   :  { %s454_s1 = scalar_lea.vmem %s19_s30, 32  ;;  %p459_p12 = scmp.lt.s32.totalorder %s19_s30, %s19_s30 }
  0x1c   :  { %p455_p11 = scmp.ne.s32.totalorder %s19_s30, %s454_s1  ;;  %p460_p13 = scmp.lt.s32.totalorder %s454_s1, %s454_s1 }
  0x1e   :  { %p461_p0 = por %p460_p13, %p459_p12 }
  0x20   :  { %p462_p1 = pnand %p461_p0, %p455_p11 }
  0x22   :  { %465 = shalt.err (!%p462_p1)
}
  0x23   :  { %21 = dma.hbm_to_vmem [thread:$0]  %s623_s0, 32, %s19_s30, [#allocation3]  }
  0x24   :  { %s466_s18 = scalar_lea.hbm %s626_s3, 2048 }
  0x25   :  { %p467_p2 = scmp.ne.s32.totalorder %s626_s3, %s466_s18  ;;  %p470_p3 = scmp.lt.u32.totalorder %s466_s18, %s626_s3 }
  0x27   :  { %p472_p4 = pnand %p470_p3, %p467_p2 }
  0x29   :  { %475 = shalt.err (!%p472_p4)
}
  0x2a   :  { %s476_s23 = scalar_lea.vmem %s42_s6, 2048  ;;  %p481_p6 = scmp.lt.s32.totalorder %s42_s6, %s42_s6 }
  0x2b   :  { %p477_p5 = scmp.ne.s32.totalorder %s42_s6, %s476_s23  ;;  %p482_p7 = scmp.lt.s32.totalorder %s476_s23, %s476_s23 }
  0x2d   :  { %p483_p8 = por %p482_p7, %p481_p6 }
  0x2f   :  { %p484_p9 = pnand %p483_p8, %p477_p5 }
  0x31   :  { %487 = shalt.err (!%p484_p9)
}
  0x32   :  { %47 = dma.hbm_to_vmem [thread:$0]  %s626_s3, 2048, %s42_s6, [#allocation6], %s517_s25, %s517_s25, %s518_s26  }
  0x33   :  { %510 = dma.done.wait [#allocation3], 32  }
  0x34   :  { %511 = vsyncadd [#allocation3], 4294967264 }
  0x35   :  { %512 = dma.done.wait [#allocation6], 4096  }
  0x36   :  { %513 = vsyncadd [#allocation6], 4294963200  ;;  %v521_v0 = vmov 0.0|0.0   ;;  %vm522_vm0 = vmmov 0   ;;  %v523_v1 = vmov 0.0   ;;  %v58_v2 = vld [vmem:[#allocation5] sm:$0xff] }
  0x37   :  { %363 = vmatprep.subr.bf16.mxu0 %v521_v0  ;;  %325 = vmatprep.mubr.msk.f32.mxu0 %vm522_vm0, %v523_v1  ;;  %v59_v3 = vld [vmem:[#allocation5 + $0x8] sm:$0xff]  ;;  %v60_v4 = vld [vmem:[#allocation5 + $0x10] sm:$0xff]  ;;  %v61_v6 = vld [vmem:[#allocation5 + $0x18] sm:$0xff]  ;;  %s524_s26 = smov [#allocation8]  }
  0x38   :  { %387 = vmatprep.subr.bf16.mxu1 %v521_v0  ;;  %360 = vmatprep.mubr.msk.f32.mxu1 %vm522_vm0, %v523_v1  ;;  %v364_v5 = vpack.c.bf16 %v59_v3, %v58_v2  ;;  %v367_v7 = vpack.c.bf16 %v61_v6, %v60_v4  ;;  %v62_v8 = vld [vmem:[#allocation5 + $0x20] sm:$0xff]  ;;  %v63_v9 = vld [vmem:[#allocation5 + $0x28] sm:$0xff]  ;;  %v154_v12 = vld [vmem:[#allocation7 + $0x10] sm:$0xff]  ;;  %s248_s27 = sshll.u32 %s524_s26, 4  ;;  %s249_s27 = int_to_ptr.vmem [resolvable:$true] %s248_s27 }
  0x39   :  { %v152_v10 = vld [vmem:[#allocation7] sm:$0xff]  ;;  %v153_v11 = vld [vmem:[#allocation7 + $0x8] sm:$0xff]  ;;  %v155_v13 = vld [vmem:[#allocation7 + $0x18] sm:$0xff]  ;;  %v370_v14 = vpack.c.bf16 %v63_v9, %v62_v8  ;;  %s488_s28 = scalar_lea.vmem %s249_s27, 32  ;;  %p493_p11 = scmp.lt.s32.totalorder %s249_s27, %s249_s27 }
  0x3a   :  { %365 = vmatpush3.bf16.msra.mxu0 %v364_v5  ;;  %v388_v15 = vpack.c.bf16 %v153_v11, %v152_v10  ;;  %v64_v16 = vld [vmem:[#allocation5 + $0x30] sm:$0xff]  ;;  %v65_v17 = vld [vmem:[#allocation5 + $0x38] sm:$0xff]  ;;  %v391_v18 = vpack.c.bf16 %v155_v13, %v154_v12  ;;  %v156_v19 = vld [vmem:[#allocation7 + $0x20] sm:$0xff]  ;;  %p489_p10 = scmp.ne.s32.totalorder %s249_s27, %s488_s28  ;;  %p494_p12 = scmp.lt.s32.totalorder %s488_s28, %s488_s28 }
  0x3b   :  { %366 = vmatprep.subr.bf16.mxu0 %v521_v0  ;;  %v157_v20 = vld [vmem:[#allocation7 + $0x28] sm:$0xff]  ;;  %v373_v21 = vpack.c.bf16 %v65_v17, %v64_v16  ;;  %v66_v22 = vld [vmem:[#allocation5 + $0x40] sm:$0xff]  ;;  %v158_v25 = vld [vmem:[#allocation7 + $0x30] sm:$0xff] }
  0x3c   :  { %389 = vmatpush3.bf16.msra.mxu1 %v388_v15  ;;  %v67_v23 = vld [vmem:[#allocation5 + $0x48] sm:$0xff]  ;;  %v394_v24 = vpack.c.bf16 %v157_v20, %v156_v19  ;;  %v159_v26 = vld [vmem:[#allocation7 + $0x38] sm:$0xff]  ;;  %v68_v28 = vld [vmem:[#allocation5 + $0x50] sm:$0xff]  ;;  %p495_p13 = por %p494_p12, %p493_p11 }
  0x3d   :  { %390 = vmatprep.subr.bf16.mxu1 %v521_v0  ;;  %v376_v27 = vpack.c.bf16 %v67_v23, %v66_v22  ;;  %v69_v29 = vld [vmem:[#allocation5 + $0x58] sm:$0xff]  ;;  %v397_v30 = vpack.c.bf16 %v159_v26, %v158_v25  ;;  %v160_v31 = vld [vmem:[#allocation7 + $0x40] sm:$0xff]  ;;  %v161_v32 = vld [vmem:[#allocation7 + $0x48] sm:$0xff] }
  0x3e   :  { %368 = vmatpush3.bf16.msra.mxu0 %v367_v7  ;;  %v379_v33 = vpack.c.bf16 %v69_v29, %v68_v28  ;;  %v70_v34 = vld [vmem:[#allocation5 + $0x60] sm:$0xff]  ;;  %v71_v35 = vld [vmem:[#allocation5 + $0x68] sm:$0xff]  ;;  %v400_v36 = vpack.c.bf16 %v161_v32, %v160_v31  ;;  %v162_v37 = vld [vmem:[#allocation7 + $0x50] sm:$0xff]  ;;  %p496_p0 = pnand %p495_p13, %p489_p10 }
  0x3f   :  { %369 = vmatprep.subr.bf16.mxu0 %v521_v0  ;;  %v163_v38 = vld [vmem:[#allocation7 + $0x58] sm:$0xff]  ;;  %v382_v39 = vpack.c.bf16 %v71_v35, %v70_v34  ;;  %v72_v40 = vld [vmem:[#allocation5 + $0x70] sm:$0xff]  ;;  %v164_v43 = vld [vmem:[#allocation7 + $0x60] sm:$0xff] }
  0x40   :  { %392 = vmatpush3.bf16.msra.mxu1 %v391_v18  ;;  %v73_v41 = vld [vmem:[#allocation5 + $0x78] sm:$0xff]  ;;  %v403_v42 = vpack.c.bf16 %v163_v38, %v162_v37  ;;  %v165_v44 = vld [vmem:[#allocation7 + $0x68] sm:$0xff]  ;;  %v166_v48 = vld [vmem:[#allocation7 + $0x70] sm:$0xff] }
  0x41   :  { %393 = vmatprep.subr.bf16.mxu1 %v521_v0  ;;  %v385_v45 = vpack.c.bf16 %v73_v41, %v72_v40  ;;  %v406_v46 = vpack.c.bf16 %v165_v44, %v164_v43  ;;  %v57_v47 = vld [vmem:[#allocation2] sm:$0x3] }
  0x42   :  { %371 = vmatpush3.bf16.msra.mxu0 %v370_v14  ;;  %v167_v49 = vld [vmem:[#allocation7 + $0x78] sm:$0xff] }
  0x43   :  { %372 = vmatprep.subr.bf16.mxu0 %v521_v0  ;;  %v409_v50 = vpack.c.bf16 %v167_v49, %v166_v48  ;;  %v258_v51 = vld [vmem:[%s625_s2] ss:$0 sm:$0xff] }
  0x44   :  { %395 = vmatpush3.bf16.msra.mxu1 %v394_v24 }
  0x45   :  { %396 = vmatprep.subr.bf16.mxu1 %v521_v0 }
  0x46   :  { %374 = vmatpush3.bf16.msra.mxu0 %v373_v21 }
  0x47   :  { %375 = vmatprep.subr.bf16.mxu0 %v521_v0 }
  0x48   :  { %398 = vmatpush3.bf16.msra.mxu1 %v397_v30 }
  0x49   :  { %399 = vmatprep.subr.bf16.mxu1 %v521_v0 }
  0x4a   :  { %377 = vmatpush3.bf16.msra.mxu0 %v376_v27 }
  0x4b   :  { %378 = vmatprep.subr.bf16.mxu0 %v521_v0 }
  0x4c   :  { %401 = vmatpush3.bf16.msra.mxu1 %v400_v36 }
  0x4d   :  { %402 = vmatprep.subr.bf16.mxu1 %v521_v0 }
  0x4e   :  { %380 = vmatpush3.bf16.msra.mxu0 %v379_v33 }
  0x4f   :  { %381 = vmatprep.subr.bf16.mxu0 %v521_v0 }
  0x50   :  { %404 = vmatpush3.bf16.msra.mxu1 %v403_v42 }
  0x51   :  { %405 = vmatprep.subr.bf16.mxu1 %v521_v0 }
  0x52   :  { %383 = vmatpush3.bf16.msra.mxu0 %v382_v39 }
  0x53   :  { %384 = vmatprep.subr.bf16.mxu0 %v521_v0 }
  0x54   :  { %407 = vmatpush3.bf16.msra.mxu1 %v406_v46 }
  0x55   :  { %408 = vmatprep.subr.bf16.mxu1 %v521_v0 }
  0x56   :  { %386 = vmatpush3.bf16.msra.mxu0 %v385_v45 }
  0x58   :  { %410 = vmatpush3.bf16.msra.mxu1 %v409_v50 }
  0x59   :  { %326 = vmatmul.mubr.f32.vlgmr.msra.gmra.mrb[0].mxu0 %v57_v47 }
 0x12c   :  { %v147_v52 = vpop.f32.mrb[0].mxu0 }
 0x12d   :  { %v148_v53 = vadd.f32 %v258_v51, %v147_v52  ;;  %v327_v54 = vpop.f32.mrb[1].mxu0 }
 0x12f   :  { %v151_v55 = vand.u32 2147483647, %v148_v53 }
 0x131   :  { %361 = vmatmul.mubr.f32.vlgmr.msra.gmra.mrb[0].mxu1 %v151_v55 }
 0x204   :  { %v234_v56 = vpop.f32.mrb[0].mxu1 }
 0x205   :  { %v238_v57 = vmax.f32 %v234_v56, 1e-12  ;;  %v362_v58 = vpop.f32.mrb[1].mxu1 }
 0x207   :  { %420 = vrcp.f32 %v238_v57 }
 0x211   :  { %v421_v59 = vpop.eup %420 }
 0x212   :  { %v240_v60 = vmul.f32 %v421_v59, %v148_v53 }
 0x214   :  { %241 = vst [vmem:[#allocation8] sm:$0x3] %v240_v60 }
 0x215   :  { %499 = shalt.err (!%p496_p0)
}
 0x216   :  { %s500_s30 = scalar_lea.hbm %s627_s4, 32 }
 0x217   :  { %p501_p1 = scmp.ne.s32.totalorder %s627_s4, %s500_s30  ;;  %p504_p2 = scmp.lt.u32.totalorder %s500_s30, %s627_s4 }
 0x219   :  { %p506_p3 = pnand %p504_p2, %p501_p1 }
 0x21b   :  { %509 = shalt.err (!%p506_p3)
}
 0x21c   :  { %251 = dma.vmem_to_hbm [thread:$0]  %s249_s27, 32, %s627_s4, [#allocation4]  }
 0x21d   :  { %514 = dma.done.wait [#allocation4], 32  }
 0x21e   :  { %515 = vsyncadd [#allocation4], 4294967264 }
 0x21f   :  { %255 = vsyncpa [#allocation3], 1 }
 0x220   :  { %256 = vsyncpa [#allocation6], 1 }
 0x221   :  { %257 = vsyncpa [#allocation4], 1 }

</bundles_post_ra>
